<compile_context>
chip_gen: v5e
topology: v5e:2x2
jax: 0.10.0
libtpu: 0.0.40
codegen_flags: <defaults>
</compile_context>

<pallas_src>
import jax
import jax.numpy as jnp
from jax import lax
from jax.experimental import pallas as pl
from jax.experimental.pallas import tpu as pltpu


# ----------------------------------------------------------------------------
# Pallas kernel: fused  conv3x3(*BNscale, +BNshift via ones-row) -> ReLU ->
#                 conv1x1 classifier (+bias).  HW stays on the lane axis.
# ----------------------------------------------------------------------------
def _seg_head_kernel(p_ref, w1_ref, w2_ref, b2_ref, o_ref):
    # p_ref  : (B, Kp, HW)   bf16  im2col patches | ones-row | zero pad
    # w1_ref : (Cmid, Kp)    bf16  3x3 weight * BN scale | BN shift | zeros
    # w2_ref : (NCLS, Cmid)  bf16  1x1 classifier weight (transposed)
    # b2_ref : (NCLS, 1)     f32   classifier bias
    # o_ref  : (B, NCLS, HW) f32   lane-dense logits
    nb = p_ref.shape[0]
    for b in range(nb):  # static unroll (B tiny) -> no per-grid-step overhead
        h = jnp.dot(w1_ref[...], p_ref[b],
                    preferred_element_type=jnp.float32)        # (Cmid, HW)
        h = jnp.maximum(h, 0.0)                                 # BN+ReLU (shift
        #                                                         folded into dot)
        logits = jnp.dot(w2_ref[...], h.astype(w2_ref.dtype),
                         preferred_element_type=jnp.float32) + b2_ref[...]
        o_ref[b, :, :] = logits.astype(o_ref.dtype)


def seg_head_pallas(patches, w1_aug, w2_t, b2_col, *, n_classes):
    # patches: (B, Kp, HW) bf16
    B, Kp, HW = patches.shape
    Cmid = w1_aug.shape[0]

    cost = pl.CostEstimate(
        flops=2 * B * HW * (Kp * Cmid + Cmid * n_classes),
        transcendentals=0,
        bytes_accessed=(2 * (B * Kp * HW + Cmid * Kp + n_classes * Cmid)
                        + 4 * (n_classes + B * n_classes * HW)),
    )

    vmem = pl.BlockSpec(memory_space=pltpu.MemorySpace.VMEM)
    return pl.pallas_call(
        _seg_head_kernel,
        out_shape=jax.ShapeDtypeStruct((B, n_classes, HW), jnp.float32),
        in_specs=[vmem, vmem, vmem, vmem],
        out_specs=vmem,
        cost_estimate=cost,
    )(patches, w1_aug, w2_t, b2_col)
    # TODO(synk): for real SegFormer feature maps (large H*W / Cin), switch to
    # H-strip grid tiling with a 2-row halo (no HBM im2col) and derive the
    # strip size from the per-generation scoped-VMEM budget (16/32/32 MiB on
    # v5e/v6e/v7x), setting vmem_limit_bytes explicitly.


# ----------------------------------------------------------------------------
# The wrapped "model": parameter construction + jitted layout glue.
# ----------------------------------------------------------------------------
class SegModelPallas:
    """Tiny SegFormer-style head whose forward runs in a Pallas kernel."""

    def __init__(self, in_channels, mid_channels, n_classes, key):
        k1, k2, k3, k4, k5, k6 = jax.random.split(key, 6)
        self.n_classes = n_classes
        self.in_channels = in_channels

        # conv1: 3x3, no bias (followed by BN) -- HWIO layout (reference form)
        self.w1 = 0.1 * jax.random.normal(
            k1, (3, 3, in_channels, mid_channels), jnp.float32)
        # BatchNorm (inference): fold into scale/shift
        gamma = 1.0 + 0.05 * jax.random.normal(k2, (mid_channels,), jnp.float32)
        beta = 0.05 * jax.random.normal(k3, (mid_channels,), jnp.float32)
        running_mean = 0.1 * jax.random.normal(k4, (mid_channels,), jnp.float32)
        running_var = jnp.abs(
            1.0 + 0.1 * jax.random.normal(k5, (mid_channels,), jnp.float32))
        eps = 1e-5
        scale = gamma / jnp.sqrt(running_var + eps)
        shift = beta - running_mean * scale
        self.bn_scale = scale.reshape(1, mid_channels)
        self.bn_shift = shift.reshape(1, mid_channels)
        # conv2: 1x1 classifier with bias
        self.w2 = 0.1 * jax.random.normal(
            k6, (mid_channels, n_classes), jnp.float32)
        self.b2 = jnp.linspace(-0.1, 0.1, n_classes,
                               dtype=jnp.float32).reshape(1, n_classes)

        # --- kernel-side (pre-folded / padded / bf16) parameters ------------
        # K ordering is (ky, kx, cin) with cin innermost -- must match the
        # channels-first im2col in _forward.
        k9 = 9 * in_channels
        kp = ((k9 + 1 + 7) // 8) * 8        # +1 ones-row (BN shift), pad to x8
        self.k9, self.kp = k9, kp
        w1_scaled = self.w1 * scale                               # (3,3,Cin,Cmid)
        w1_folded = jnp.transpose(w1_scaled.reshape(k9, mid_channels))  # (Cmid,K9)
        w1_aug = jnp.concatenate(
            [w1_folded,
             shift.reshape(mid_channels, 1),                      # ones-row column
             jnp.zeros((mid_channels, kp - k9 - 1), jnp.float32)],  # sublane pad
            axis=1)                                               # (Cmid, Kp)
        self.w1_aug = w1_aug.astype(jnp.bfloat16)
        self.w2_t = jnp.transpose(self.w2).astype(jnp.bfloat16)   # (NCLS, Cmid)
        self.b2_col = self.b2.reshape(n_classes, 1)               # (NCLS, 1) f32

        # jit the full forward (pad + im2col + concat + pallas_call + reshape)
        # so all layout glue fuses into the single kernel dispatch.
        self._jit_forward = jax.jit(self._forward)

    def _forward(self, x_nchw):
        B, C, H, W = x_nchw.shape
        HW = H * W
        # Channels-first im2col straight from NCHW: no NCHW<->NHWC transposes.
        x_pad = jnp.pad(x_nchw, ((0, 0), (0, 0), (1, 1), (1, 1)))
        taps = [x_pad[:, :, ky:ky + H, kx:kx + W]
                for ky in range(3) for kx in range(3)]
        patches = jnp.stack(taps, axis=1).reshape(B, 9 * C, HW)  # (B, 9C, HW)
        # Append constant-1 row (folds BN shift into the matmul) and zero-pad
        # the contraction dim to a sublane-dense multiple of 8 (36 -> 40).
        ones = jnp.ones((B, 1, HW), x_nchw.dtype)
        zpad = jnp.zeros((B, self.kp - self.k9 - 1, HW), x_nchw.dtype)
        patches = jnp.concatenate([patches, ones, zpad], axis=1)  # (B, Kp, HW)
        patches = patches.astype(jnp.bfloat16)

        out = seg_head_pallas(patches, self.w1_aug, self.w2_t, self.b2_col,
                              n_classes=self.n_classes)   # (B, NCLS, HW) f32
        # NCHW output is a free metadata reshape of the lane-dense result.
        return out.reshape(B, self.n_classes, H, W)

    def __call__(self, x_nchw):
        return self._jit_forward(x_nchw)

    # pure-JAX fp32 reference (un-folded weights) for verification
    def reference(self, x_nchw):
        x = jnp.transpose(x_nchw, (0, 2, 3, 1))
        y = lax.conv_general_dilated(
            x, self.w1, window_strides=(1, 1), padding="SAME",
            dimension_numbers=("NHWC", "HWIO", "NHWC"))
        y = y * self.bn_scale[0] + self.bn_shift[0]
        y = jnp.maximum(y, 0.0)
        y = jnp.einsum("bhwc,cn->bhwn", y, self.w2) + self.b2[0]
        return jnp.transpose(y, (0, 3, 1, 2))


class FullModelInfer:
    """JAX/Pallas port of FullModel_infer: forward = model(inputs) only."""

    def __init__(self, model, loss=None):
        self.model = model
        self.loss = loss  # unused at inference, kept for API parity

    def __call__(self, inputs, labels=None, *args, **kwargs):
        outputs = self.model(inputs, *args, **kwargs)
        return outputs


# ----------------------------------------------------------------------------
# main
# ----------------------------------------------------------------------------
if __name__ == "__main__":
    key = jax.random.PRNGKey(0)
    k_param, k_input = jax.random.split(key)

    B, C, H, W = 2, 4, 16, 16        # small NCHW input (range-image style)
    MID, NCLS = 32, 8

    model = SegModelPallas(in_channels=C, mid_channels=MID,
                           n_classes=NCLS, key=k_param)
    full = FullModelInfer(model, loss=None)

    x = jax.random.normal(k_input, (B, C, H, W), jnp.float32)

    out = jax.block_until_ready(full(x))
    ref = jax.block_until_ready(model.reference(x))

    assert out.shape == (B, NCLS, H, W)
    # bf16 inputs / fp32 accumulation: relaxed tolerance vs. the fp32 reference
    max_err = float(jnp.max(jnp.abs(out - ref)))
    assert jnp.allclose(out, ref, atol=3e-2, rtol=3e-2), max_err

    print("KERNEL_OK")
</pallas_src>

<mosaic_0001>
module attributes {stable_mosaic.version = 11 : i64} {
  func.func @_seg_head_kernel(%arg0: memref<2x40x256xbf16, #tpu.memory_space<vmem>>, %arg1: memref<32x40xbf16, #tpu.memory_space<vmem>>, %arg2: memref<8x32xbf16, #tpu.memory_space<vmem>>, %arg3: memref<8x1xf32, #tpu.memory_space<vmem>>, %arg4: memref<2x8x256xf32, #tpu.memory_space<vmem>>) attributes {dimension_semantics = [], scalar_prefetch = 0 : i64, scratch_operands = 0 : i64, tpu.core_type = #tpu.core_type<tc>} {
    %c0 = arith.constant 0 : index
    %c0_0 = arith.constant 0 : index
    %0 = vector.load %arg1[%c0, %c0_0] : memref<32x40xbf16, #tpu.memory_space<vmem>>, vector<32x40xbf16>
    %c0_1 = arith.constant 0 : index
    %c0_2 = arith.constant 0 : index
    %c0_3 = arith.constant 0 : index
    %1 = vector.load %arg0[%c0_1, %c0_2, %c0_3] : memref<2x40x256xbf16, #tpu.memory_space<vmem>>, vector<1x40x256xbf16>
    %2 = vector.shape_cast %1 : vector<1x40x256xbf16> to vector<40x256xbf16>
    %cst = arith.constant dense<0.000000e+00> : vector<32x256xf32>
    %3 = tpu.matmul %0, %2, %cst {dimension_numbers = #tpu.dot_dimension_numbers<[1], [0], [0], [1], [0, 0, 1, 1], [], []>} : vector<32x40xbf16>, vector<40x256xbf16>, vector<32x256xf32> -> vector<32x256xf32>
    %cst_4 = arith.constant 0.000000e+00 : f32
    %4 = vector.broadcast %cst_4 : f32 to vector<32x256xf32>
    %5 = arith.maximumf %3, %4 : vector<32x256xf32>
    %c0_5 = arith.constant 0 : index
    %c0_6 = arith.constant 0 : index
    %6 = vector.load %arg2[%c0_5, %c0_6] : memref<8x32xbf16, #tpu.memory_space<vmem>>, vector<8x32xbf16>
    %7 = arith.truncf %5 : vector<32x256xf32> to vector<32x256xbf16>
    %cst_7 = arith.constant dense<0.000000e+00> : vector<8x256xf32>
    %8 = tpu.matmul %6, %7, %cst_7 {dimension_numbers = #tpu.dot_dimension_numbers<[1], [0], [0], [1], [0, 0, 1, 1], [], []>} : vector<8x32xbf16>, vector<32x256xbf16>, vector<8x256xf32> -> vector<8x256xf32>
    %c0_8 = arith.constant 0 : index
    %c0_9 = arith.constant 0 : index
    %9 = vector.load %arg3[%c0_8, %c0_9] : memref<8x1xf32, #tpu.memory_space<vmem>>, vector<8x1xf32>
    %10 = vector.broadcast %9 : vector<8x1xf32> to vector<8x256xf32>
    %11 = arith.addf %8, %10 : vector<8x256xf32>
    %c0_10 = arith.constant 0 : index
    %c0_11 = arith.constant 0 : index
    %c0_12 = arith.constant 0 : index
    %12 = vector.load %arg4[%c0_10, %c0_11, %c0_12] : memref<2x8x256xf32, #tpu.memory_space<vmem>>, vector<1x8x256xf32>
    %13 = vector.shape_cast %12 : vector<1x8x256xf32> to vector<8x256xf32>
    %14 = vector.shape_cast %11 : vector<8x256xf32> to vector<1x8x256xf32>
    tpu.vector_store %arg4[%c0_10, %c0_11, %c0_12], %14 {strides = array<i32>} : memref<2x8x256xf32, #tpu.memory_space<vmem>>, vector<1x8x256xf32>,
    %c0_13 = arith.constant 0 : index
    %c0_14 = arith.constant 0 : index
    %15 = vector.load %arg1[%c0_13, %c0_14] : memref<32x40xbf16, #tpu.memory_space<vmem>>, vector<32x40xbf16>
    %c1 = arith.constant 1 : index
    %c0_15 = arith.constant 0 : index
    %c0_16 = arith.constant 0 : index
    %16 = vector.load %arg0[%c1, %c0_15, %c0_16] : memref<2x40x256xbf16, #tpu.memory_space<vmem>>, vector<1x40x256xbf16>
    %17 = vector.shape_cast %16 : vector<1x40x256xbf16> to vector<40x256xbf16>
    %cst_17 = arith.constant dense<0.000000e+00> : vector<32x256xf32>
    %18 = tpu.matmul %15, %17, %cst_17 {dimension_numbers = #tpu.dot_dimension_numbers<[1], [0], [0], [1], [0, 0, 1, 1], [], []>} : vector<32x40xbf16>, vector<40x256xbf16>, vector<32x256xf32> -> vector<32x256xf32>
    %cst_18 = arith.constant 0.000000e+00 : f32
    %19 = vector.broadcast %cst_18 : f32 to vector<32x256xf32>
    %20 = arith.maximumf %18, %19 : vector<32x256xf32>
    %c0_19 = arith.constant 0 : index
    %c0_20 = arith.constant 0 : index
    %21 = vector.load %arg2[%c0_19, %c0_20] : memref<8x32xbf16, #tpu.memory_space<vmem>>, vector<8x32xbf16>
    %22 = arith.truncf %20 : vector<32x256xf32> to vector<32x256xbf16>
    %cst_21 = arith.constant dense<0.000000e+00> : vector<8x256xf32>
    %23 = tpu.matmul %21, %22, %cst_21 {dimension_numbers = #tpu.dot_dimension_numbers<[1], [0], [0], [1], [0, 0, 1, 1], [], []>} : vector<8x32xbf16>, vector<32x256xbf16>, vector<8x256xf32> -> vector<8x256xf32>
    %c0_22 = arith.constant 0 : index
    %c0_23 = arith.constant 0 : index
    %24 = vector.load %arg3[%c0_22, %c0_23] : memref<8x1xf32, #tpu.memory_space<vmem>>, vector<8x1xf32>
    %25 = vector.broadcast %24 : vector<8x1xf32> to vector<8x256xf32>
    %26 = arith.addf %23, %25 : vector<8x256xf32>
    %c1_24 = arith.constant 1 : index
    %c0_25 = arith.constant 0 : index
    %c0_26 = arith.constant 0 : index
    %27 = vector.load %arg4[%c1_24, %c0_25, %c0_26] : memref<2x8x256xf32, #tpu.memory_space<vmem>>, vector<1x8x256xf32>
    %28 = vector.shape_cast %27 : vector<1x8x256xf32> to vector<8x256xf32>
    %29 = vector.shape_cast %26 : vector<8x256xf32> to vector<1x8x256xf32>
    tpu.vector_store %arg4[%c1_24, %c0_25, %c0_26], %29 {strides = array<i32>} : memref<2x8x256xf32, #tpu.memory_space<vmem>>, vector<1x8x256xf32>,
    return
  }
}

</mosaic_0001>

<bundles_post_ra>
// kernel: _forward.1
= control target key start
LH: loop header
LB: loop body
LE: loop exit
PB: predicated region body
PF: predicated region fallthrough
CT: control target
= control target key end

     0   :  { %vm69_vm0 = vcmask 1043456   ;;  %vm62_vm1 = vcmask 326656   ;;  %v396_v25 = vmov 0   ;;  %vm133_vm2 = vcmask 261120   ;;  %s525_s0 = inlined_call_operand.vmem [shape: bf16[2,40,256], index: 0, kind: input, shape index: {}]   ;;  %s526_s1 = inlined_call_operand.vmem [shape: bf16[32,40], index: 1, kind: input, shape index: {}]   ;;  %s527_s3 = inlined_call_operand.vmem [shape: f32[8,1], index: 3, kind: input, shape index: {}]   ;;  %s528_s2 = inlined_call_operand.vmem [shape: bf16[8,32], index: 2, kind: input, shape index: {}]   ;;  %s529_s4 = inlined_call_operand.vmem [shape: f32[2,8,256], index: 4, kind: output, shape index: {}]  }
   0x1   :  { %v26_v0 = vld [vmem:[%s525_s0 + $0x20] sm:$0xff]  ;;  %v333_v3 = vld [vmem:[%s525_s0 + $0x10] sm:$0xf]  ;;  %v387_v6 = vld [vmem:[%s525_s0 + $0x14] sm:$0xf0]  ;;  %395 = vset.pattern.permute.xlu0 %v396_v25 }
   0x2   :  { %v50_v1 = vunpack.c.l.b16 %v26_v0  ;;  %v51_v2 = vunpack.c.h.b16 %v26_v0  ;;  %v386_v7 = vld [vmem:[%s525_s0 + $0x14] sm:$0xf]  ;;  %v335_v8 = vld [vmem:[%s525_s0 + $0x18] sm:$0xf0]  ;;  %v334_v11 = vor.u32 %v387_v6, %v333_v3  ;;  %v325_v13 = vld [vmem:[%s525_s0] sm:$0xf] }
   0x3   :  { %v338_v12 = vor.u32 %v386_v7, %v335_v8  ;;  %v385_v14 = vld [vmem:[%s525_s0 + $0x4] sm:$0xf0]  ;;  %v384_v15 = vld [vmem:[%s525_s0 + $0x4] sm:$0xf]  ;;  %v327_v16 = vld [vmem:[%s525_s0 + $0x8] sm:$0xf0] }
   0x4   :  { %v56_v4 = vpack.c.b16 %v50_v1, %v50_v1  ;;  %v57_v5 = vpack.c.b16 %v51_v2, %v51_v2  ;;  %v326_v17 = vor.u32 %v385_v14, %v325_v13  ;;  %v330_v18 = vor.u32 %v384_v15, %v327_v16  ;;  %v382_v19 = vld [vmem:[%s526_s1] sm:$0xff]  ;;  %v383_v20 = vld [vmem:[%s526_s1 + $0x8] sm:$0xff]  ;;  %v368_v46 = vld [vmem:[%s525_s0 + $0x38] sm:$0xf] }
   0x5   :  { %v349_v28 = vld [vmem:[%s525_s0 + $0x48] sm:$0xff]  ;;  %v127_v29 = vld [vmem:[%s527_s3] sm:$0xff]  ;;  %v392_v52 = vld [vmem:[%s525_s0 + $0x3c] sm:$0xf] }
   0x6   :  { %v71_v9 = vsel %vm69_vm0, %v56_v4, 0  ;;  %v74_v10 = vsel %vm69_vm0, %v57_v5, 0  ;;  %130 = vperm.xlu0 %395, %v127_v29   ;;  %v198_v30 = vunpack.c.l.b16 %v349_v28  ;;  %v199_v31 = vunpack.c.h.b16 %v349_v28  ;;  %v393_v47 = vld [vmem:[%s525_s0 + $0x3c] sm:$0xf0]  ;;  %v370_v53 = vld [vmem:[%s525_s0 + $0x40] sm:$0xf0] }
   0x7   :  { %81 = vmatpush.bf16.msra.mxu0 %v71_v9  ;;  %100 = vmatpush.bf16.msra.mxu1 %v74_v10  ;;  %v122_v54 = vld [vmem:[%s528_s2] sm:$0xf]  ;;  %v369_v55 = vor.u32 %v393_v47, %v368_v46  ;;  %v373_v56 = vor.u32 %v392_v52, %v370_v53  ;;  %v360_v57 = vld [vmem:[%s525_s0 + $0x28] sm:$0xf]  ;;  %v391_v58 = vld [vmem:[%s525_s0 + $0x2c] sm:$0xf0] }
   0x8   :  { %v204_v38 = vpack.c.b16 %v198_v30, %v198_v30  ;;  %v205_v39 = vpack.c.b16 %v199_v31, %v199_v31  ;;  %v390_v59 = vld [vmem:[%s525_s0 + $0x2c] sm:$0xf]  ;;  %v362_v60 = vld [vmem:[%s525_s0 + $0x30] sm:$0xf0]  ;;  %v361_v61 = vor.u32 %v391_v58, %v360_v57  ;;  %v388_v63 = vld [vmem:[%s526_s1] sm:$0xff] }
   0x9   :  { %v365_v62 = vor.u32 %v390_v59, %v362_v60  ;;  %v389_v0 = vld [vmem:[%s526_s1 + $0x8] sm:$0xff]  ;;  %v268_v28 = vld [vmem:[%s528_s2] sm:$0xf] }
   0xa   :  { %v217_v50 = vsel %vm69_vm0, %v204_v38, 0  ;;  %v220_v51 = vsel %vm69_vm0, %v205_v39, 0 }
   0xb   :  { %82 = vmatpush.bf16.msra.mxu0 %v334_v11  ;;  %101 = vmatpush.bf16.msra.mxu1 %v338_v12 }
   0xe   :  { %276 = vperm.xlu0 %395, %v127_v29  }
   0xf   :  { %83 = vmatpush.bf16.msra.mxu0 %v326_v17  ;;  %102 = vmatpush.bf16.msra.mxu1 %v330_v18 }
  0x12   :  { %339 = vmatmul.msk.bf16.vlgmr.msra.gmra.mxu0 %vm62_vm1, %v382_v19  ;;  %341 = vmatmul.msk.bf16.vlgmr.msra.gmra.mxu1 %vm62_vm1, %v382_v19 }
  0x22   :  { %340 = vmatmul.msk.bf16.gmra.mxu0 %vm62_vm1, %v383_v20  ;;  %342 = vmatmul.msk.bf16.gmra.mxu1 %vm62_vm1, %v383_v20 }
  0x78   :  { %v131_v1 = vpop.permute.xlu0 %130 }
  0x80   :  { %v277_v29 = vpop.permute.xlu0 %276 }
  0x8f   :  { %v85_v21 = vpop.f32.mrf.mxu0  ;;  %v104_v22 = vpop.f32.mrf.mxu1 }
  0x90   :  { %v114_v44 = vmax.f32 %v85_v21, 0.0  ;;  %v115_v45 = vmax.f32 %v104_v22, 0.0 }
  0x97   :  { %v87_v23 = vpop.f32.mrf.mxu0  ;;  %v106_v24 = vpop.f32.mrf.mxu1 }
  0x98   :  { %v116_v40 = vmax.f32 %v87_v23, 0.0  ;;  %v117_v41 = vmax.f32 %v106_v24, 0.0 }
  0x9a   :  { %v123_v48 = vpack.c.bf16 %v116_v40, %v114_v44  ;;  %v124_v49 = vpack.c.bf16 %v117_v41, %v115_v45 }
  0x9f   :  { %v90_v26 = vpop.f32.mrf.mxu0  ;;  %v109_v27 = vpop.f32.mrf.mxu1 }
  0xa0   :  { %v118_v34 = vmax.f32 %v90_v26, 0.0  ;;  %v119_v35 = vmax.f32 %v109_v27, 0.0 }
  0xa7   :  { %v92_v32 = vpop.f32.mrf.mxu0  ;;  %v111_v33 = vpop.f32.mrf.mxu1 }
  0xa8   :  { %v120_v36 = vmax.f32 %v92_v32, 0.0  ;;  %v121_v37 = vmax.f32 %v111_v33, 0.0 }
  0xaa   :  { %v125_v42 = vpack.c.bf16 %v120_v36, %v118_v34  ;;  %v126_v43 = vpack.c.bf16 %v121_v37, %v119_v35 }
  0xac   :  { %143 = vmatpush.bf16.msra.mxu2 %v125_v42  ;;  %156 = vmatpush.bf16.msra.mxu3 %v126_v43 }
  0xb0   :  { %144 = vmatpush.bf16.msra.mxu2 %v123_v48  ;;  %157 = vmatpush.bf16.msra.mxu3 %v124_v49 }
  0xb3   :  { %343 = vmatmul.msk.bf16.vlgmr.msra.gmra.mxu2 %vm133_vm2, %v122_v54  ;;  %344 = vmatmul.msk.bf16.vlgmr.msra.gmra.mxu3 %vm133_vm2, %v122_v54 }
  0xb4   :  { %227 = vmatpush.bf16.msrb.mxu2 %v217_v50  ;;  %246 = vmatpush.bf16.msrb.mxu3 %v220_v51 }
  0xb8   :  { %228 = vmatpush.bf16.msrb.mxu2 %v369_v55  ;;  %247 = vmatpush.bf16.msrb.mxu3 %v373_v56 }
  0xbc   :  { %229 = vmatpush.bf16.msrb.mxu2 %v361_v61  ;;  %248 = vmatpush.bf16.msrb.mxu3 %v365_v62 }
  0xc3   :  { %374 = vmatmul.msk.bf16.vlgmr.msrb.gmra.mxu2 %vm62_vm1, %v388_v63  ;;  %376 = vmatmul.msk.bf16.vlgmr.msrb.gmra.mxu3 %vm62_vm1, %v388_v63 }
  0xd3   :  { %375 = vmatmul.msk.bf16.gmra.mxu2 %vm62_vm1, %v389_v0  ;;  %377 = vmatmul.msk.bf16.gmra.mxu3 %vm62_vm1, %v389_v0 }
 0x136   :  { %v146_v2 = vpop.f32.mrf.mxu2  ;;  %v159_v3 = vpop.f32.mrf.mxu3 }
 0x137   :  { %v147_v4 = vadd.f32 %v146_v2, %v131_v1  ;;  %v160_v5 = vadd.f32 %v159_v3, %v131_v1 }
 0x139   :  { %163 = vst [vmem:[%s529_s4] sm:$0xff] %v147_v4 }
 0x13a   :  { %164 = vst [vmem:[%s529_s4 + $0x8] sm:$0xff] %v160_v5 }
 0x13e   :  { %v148_v6 = vpop.f32.mrf.mxu2  ;;  %v161_v7 = vpop.f32.mrf.mxu3 }
 0x146   :  { %v231_v8 = vpop.f32.mrf.mxu2  ;;  %v250_v9 = vpop.f32.mrf.mxu3 }
 0x147   :  { %v260_v24 = vmax.f32 %v231_v8, 0.0  ;;  %v261_v25 = vmax.f32 %v250_v9, 0.0 }
 0x14e   :  { %v233_v10 = vpop.f32.mrf.mxu2  ;;  %v252_v11 = vpop.f32.mrf.mxu3 }
 0x14f   :  { %v262_v20 = vmax.f32 %v233_v10, 0.0  ;;  %v263_v21 = vmax.f32 %v252_v11, 0.0 }
 0x151   :  { %v269_v26 = vpack.c.bf16 %v262_v20, %v260_v24  ;;  %v270_v27 = vpack.c.bf16 %v263_v21, %v261_v25 }
 0x156   :  { %v236_v12 = vpop.f32.mrf.mxu2  ;;  %v255_v13 = vpop.f32.mrf.mxu3 }
 0x157   :  { %v264_v16 = vmax.f32 %v236_v12, 0.0  ;;  %v265_v17 = vmax.f32 %v255_v13, 0.0 }
 0x15e   :  { %v238_v14 = vpop.f32.mrf.mxu2  ;;  %v257_v15 = vpop.f32.mrf.mxu3 }
 0x15f   :  { %v266_v18 = vmax.f32 %v238_v14, 0.0  ;;  %v267_v19 = vmax.f32 %v257_v15, 0.0 }
 0x161   :  { %v271_v22 = vpack.c.bf16 %v266_v18, %v264_v16  ;;  %v272_v23 = vpack.c.bf16 %v267_v19, %v265_v17 }
 0x163   :  { %288 = vmatpush.bf16.msrb.mxu0 %v271_v22  ;;  %301 = vmatpush.bf16.msrb.mxu1 %v272_v23 }
 0x167   :  { %289 = vmatpush.bf16.msrb.mxu0 %v269_v26  ;;  %302 = vmatpush.bf16.msrb.mxu1 %v270_v27 }
 0x16a   :  { %378 = vmatmul.msk.bf16.vlgmr.msrb.gmra.mxu0 %vm133_vm2, %v268_v28  ;;  %379 = vmatmul.msk.bf16.vlgmr.msrb.gmra.mxu1 %vm133_vm2, %v268_v28 }
 0x1e7   :  { %v291_v30 = vpop.f32.mrf.mxu0  ;;  %v304_v31 = vpop.f32.mrf.mxu1 }
 0x1e8   :  { %v292_v32 = vadd.f32 %v291_v30, %v277_v29  ;;  %v305_v33 = vadd.f32 %v304_v31, %v277_v29 }
 0x1ea   :  { %380 = vst [vmem:[%s529_s4 + $0x10] sm:$0xff] %v292_v32 }
 0x1eb   :  { %381 = vst [vmem:[%s529_s4 + $0x18] sm:$0xff] %v305_v33 }
 0x1ef   :  { %v293_v34 = vpop.f32.mrf.mxu0  ;;  %v306_v35 = vpop.f32.mrf.mxu1 }

</bundles_post_ra>
